<compile_context>
chip_gen: v7x
topology: tpu7x:2x2x1
jax: 0.10.0
libtpu: 0.0.40
codegen_flags: <defaults>
</compile_context>

<pallas_src>
import functools

import jax
import jax.numpy as jnp
import numpy as np
from jax import lax
from jax.experimental import pallas as pl
from jax.experimental.pallas import tpu as pltpu


# ----------------------------------------------------------------------------
# Fused LayerNorm kernel: one (tm, D) tile per grid step.
# ----------------------------------------------------------------------------
def _layernorm_kernel(x_ref, g_ref, o_ref, *, eps, stable):
    x = x_ref[...].astype(jnp.float32)                 # (tm, D) compute in f32
    mean = jnp.mean(x, axis=-1, keepdims=True)         # (tm, 1)  XLU reduce
    xc = x - mean
    var = jnp.mean(xc * xc, axis=-1, keepdims=True)    # biased (unbiased=False)
    if stable:
        # torch: x' = x / amax(x);  LayerNorm(x') folds to
        #   sign(a) * (x - mean) * rsqrt(var + eps * a^2) * g
        # (identical up to rounding; avoids a full (tm, D) divide).
        a = jnp.max(x, axis=-1, keepdims=True)         # (tm, 1)
        inv = jnp.sign(a) * lax.rsqrt(var + eps * a * a)
    else:
        inv = lax.rsqrt(var + eps)                     # EUP transcendental
    g = g_ref[...].astype(jnp.float32)                 # (1, D) broadcast
    o_ref[...] = (xc * inv * g).astype(o_ref.dtype)


def _choose_row_tile(m, d, itemsize):
    """Row tile (multiple of 8) from a ~4 MiB per-block budget, capped so the
    grid has >= 4 steps when M allows it (>= 2 steps per TensorCore on v7x)."""
    budget_bytes = 4 * 1024 * 1024                     # per block; 2 in + 2 out
    cap_rows = max(8, (budget_bytes // (itemsize * d)) // 8 * 8)
    min_steps = 4
    rows_per_step = max(8, ((-(-m // min_steps) + 7) // 8) * 8)
    return min(cap_rows, rows_per_step)


def layernorm(x, g, *, eps=1e-5, fp16_eps=1e-3, stable=False):
    """x: (..., D), g: (D,). Returns LayerNorm(x) with the module's semantics."""
    orig_shape = x.shape
    orig_dtype = x.dtype
    D = orig_shape[-1]
    assert g.shape == (D,), g.shape
    e = float(eps) if orig_dtype == jnp.float32 else float(fp16_eps)

    x2 = x.reshape(-1, D)                              # metadata-only reshape
    M = x2.shape[0]
    itemsize = jnp.dtype(orig_dtype).itemsize
    tm = _choose_row_tile(M, D, itemsize)
    grid = (pl.cdiv(M, tm),)                           # ragged tail masked in-kernel
    g2 = g.reshape(1, D)

    cost = pl.CostEstimate(
        flops=8 * M * D,
        transcendentals=M,
        bytes_accessed=M * D * itemsize * 2 + D * itemsize,
    )

    out = pl.pallas_call(
        functools.partial(_layernorm_kernel, eps=e, stable=stable),
        out_shape=jax.ShapeDtypeStruct((M, D), orig_dtype),
        grid=grid,
        in_specs=[
            pl.BlockSpec((tm, D), lambda i: (i, 0)),   # lane-dense: full D
            pl.BlockSpec((1, D), lambda i: (0, 0)),    # g, tiny, resident
        ],
        out_specs=pl.BlockSpec((tm, D), lambda i: (i, 0)),
        compiler_params=pltpu.CompilerParams(
            dimension_semantics=("parallel",),
            vmem_limit_bytes=32 * 1024 * 1024,         # covers v5e's 16 MiB default
        ),
        cost_estimate=cost,
    )(x2, g2)

    return out.reshape(orig_shape)


# ----------------------------------------------------------------------------
# Pure-JAX reference (mirrors the PyTorch forward exactly).
# ----------------------------------------------------------------------------
def layernorm_ref(x, g, *, eps=1e-5, fp16_eps=1e-3, stable=False):
    e = eps if x.dtype == jnp.float32 else fp16_eps
    xf = x.astype(jnp.float32)
    if stable:
        xf = xf / jnp.max(xf, axis=-1, keepdims=True)
    mean = jnp.mean(xf, axis=-1, keepdims=True)
    var = jnp.mean((xf - mean) ** 2, axis=-1, keepdims=True)
    return ((xf - mean) * lax.rsqrt(var + e) * g.astype(jnp.float32)).astype(x.dtype)


# ----------------------------------------------------------------------------
if __name__ == "__main__":
    B, S, D = 2, 128, 256  # M = 256 rows -> 4 parallel tiles of 64; lanes = 256

    key = jax.random.PRNGKey(0)
    kx, kg, kr = jax.random.split(key, 3)
    x = jax.random.normal(kx, (B, S, D), jnp.float32)
    # module init is g = ones; perturb slightly so the affine path is verified
    g = 1.0 + 0.1 * jax.random.normal(kg, (D,), jnp.float32)

    out = jax.block_until_ready(layernorm(x, g))
    ref = layernorm_ref(x, g)
    assert out.shape == (B, S, D) and out.dtype == jnp.float32
    np.testing.assert_allclose(np.asarray(out), np.asarray(ref), rtol=1e-5, atol=1e-5)

    # stable=True branch (amax folded into eps inside the kernel)
    out_s = jax.block_until_ready(layernorm(x, g, stable=True))
    ref_s = layernorm_ref(x, g, stable=True)
    np.testing.assert_allclose(np.asarray(out_s), np.asarray(ref_s), rtol=1e-5, atol=1e-5)

    # Ragged row count (M = 21, not a multiple of 8): masked tail inside the
    # kernel, no wrapper pad/slice passes.
    xr = jax.random.normal(kr, (3, 7, D), jnp.float32)
    out_r = jax.block_until_ready(layernorm(xr, g))
    ref_r = layernorm_ref(xr, g)
    np.testing.assert_allclose(np.asarray(out_r), np.asarray(ref_r), rtol=1e-5, atol=1e-5)

    # bf16 path exercises fp16_eps and the itemsize-aware tiling.
    xb = x.astype(jnp.bfloat16)
    gb = g.astype(jnp.bfloat16)
    out_b = jax.block_until_ready(layernorm(xb, gb))
    ref_b = layernorm_ref(xb, gb)
    np.testing.assert_allclose(
        np.asarray(out_b, dtype=np.float32),
        np.asarray(ref_b, dtype=np.float32),
        rtol=2e-2, atol=2e-2,
    )

    print("KERNEL_OK")
</pallas_src>

<mosaic_0001>
module attributes {stable_mosaic.version = 11 : i64} {
  func.func @_layernorm_kernel(%arg0: i32, %arg1: memref<64x256xf32, #tpu.memory_space<vmem>>, %arg2: memref<1x256xf32, #tpu.memory_space<vmem>>, %arg3: memref<64x256xf32, #tpu.memory_space<vmem>>) attributes {dimension_semantics = [#tpu.dimension_semantics<parallel>], iteration_bounds = array<i64: 4>, scalar_prefetch = 0 : i64, scratch_operands = 0 : i64, tpu.core_type = #tpu.core_type<tc>, window_params = [{transform_indices = @transform_0, window_bounds = array<i64: 64, 256>}, {pipeline_mode = #tpu.pipeline_mode<synchronous>, transform_indices = @transform_1, window_bounds = array<i64: 1, 256>}, {transform_indices = @transform_2, window_bounds = array<i64: 64, 256>}]} {
    %c0 = arith.constant 0 : index
    %c0_0 = arith.constant 0 : index
    %0 = vector.load %arg1[%c0, %c0_0] : memref<64x256xf32, #tpu.memory_space<vmem>>, vector<64x256xf32>
    %cst = arith.constant dense<0.000000e+00> : vector<64xf32>
    %1 = vector.multi_reduction <add>, %0, %cst [1] : vector<64x256xf32> to vector<64xf32>
    %2 = vector.shape_cast %1 : vector<64xf32> to vector<64x1xf32>
    %cst_1 = arith.constant 2.560000e+02 : f32
    %3 = vector.broadcast %cst_1 : f32 to vector<64x1xf32>
    %4 = arith.divf %2, %3 : vector<64x1xf32>
    %5 = vector.broadcast %4 : vector<64x1xf32> to vector<64x256xf32>
    %6 = arith.subf %0, %5 : vector<64x256xf32>
    %7 = arith.mulf %6, %6 : vector<64x256xf32>
    %cst_2 = arith.constant dense<0.000000e+00> : vector<64xf32>
    %8 = vector.multi_reduction <add>, %7, %cst_2 [1] : vector<64x256xf32> to vector<64xf32>
    %9 = vector.shape_cast %8 : vector<64xf32> to vector<64x1xf32>
    %cst_3 = arith.constant 2.560000e+02 : f32
    %10 = vector.broadcast %cst_3 : f32 to vector<64x1xf32>
    %11 = arith.divf %9, %10 : vector<64x1xf32>
    %cst_4 = arith.constant 9.99999974E-6 : f32
    %12 = vector.broadcast %cst_4 : f32 to vector<64x1xf32>
    %13 = arith.addf %11, %12 : vector<64x1xf32>
    %14 = math.rsqrt %13 : vector<64x1xf32>
    %c0_5 = arith.constant 0 : index
    %c0_6 = arith.constant 0 : index
    %15 = vector.load %arg2[%c0_5, %c0_6] : memref<1x256xf32, #tpu.memory_space<vmem>>, vector<1x256xf32>
    %16 = vector.broadcast %14 : vector<64x1xf32> to vector<64x256xf32>
    %17 = arith.mulf %6, %16 : vector<64x256xf32>
    %18 = vector.broadcast %15 : vector<1x256xf32> to vector<64x256xf32>
    %19 = arith.mulf %17, %18 : vector<64x256xf32>
    %c0_7 = arith.constant 0 : index
    %c0_8 = arith.constant 0 : index
    %20 = vector.load %arg3[%c0_7, %c0_8] : memref<64x256xf32, #tpu.memory_space<vmem>>, vector<64x256xf32>
    tpu.vector_store %arg3[%c0_7, %c0_8], %19 {strides = array<i32>} : memref<64x256xf32, #tpu.memory_space<vmem>>, vector<64x256xf32>,
    return
  }
  func.func @transform_0(%arg0: i32) -> (i32, i32) {
    %c0_i32 = arith.constant 0 : i32
    %c0_i32_0 = arith.constant 0 : i32
    return %arg0, %c0_i32 : i32, i32
  }
  func.func @transform_1(%arg0: i32) -> (i32, i32) {
    %c0_i32 = arith.constant 0 : i32
    %c0_i32_0 = arith.constant 0 : i32
    %c0_i32_1 = arith.constant 0 : i32
    return %c0_i32, %c0_i32_0 : i32, i32
  }
  func.func @transform_2(%arg0: i32) -> (i32, i32) {
    %c0_i32 = arith.constant 0 : i32
    %c0_i32_0 = arith.constant 0 : i32
    return %arg0, %c0_i32 : i32, i32
  }
}

</mosaic_0001>

<bundles_post_ra>
// kernel: tpu_custom_call.1
= control target key start
LH: loop header
LB: loop body
LE: loop exit
PB: predicated region body
PF: predicated region fallthrough
CT: control target
= control target key end

     0   :  { %7 = vsyncpa [#allocation3], 0  ;;  %s933_s0 = inlined_call_operand.hbm [shape: f32[256,256], index: 0, kind: input, shape index: {}]   ;;  %s934_s1 = inlined_call_operand.vmem [shape: f32[1,256], index: 1, kind: input, shape index: {}]   ;;  %s935_s2 = inlined_call_operand.hbm [shape: f32[256,256], index: 2, kind: output, shape index: {}]  }
   0x1   :  { %9 = vsyncpa [#allocation3 + $0x1], 0 }
   0x2   :  { %10 = vsyncpa [#allocation4], 0 }
   0x3   :  { %12 = vsyncpa [#allocation4 + $0x1], 0  ;;  %s647_s9 = smov 0   ;;  %s649_s10 = smov 0  }
   0x4   :  { %s651_s11 = smov 0   ;;  %s653_s12 = smov 0  }
   0x5 LB: > { %s668_s13 = sadd.s32 4294967295, %s624_s12   ;;  %s442_s14 = sadd.s32 4294967294, %s624_s12   ;;  %s624_s12 = sphi %s653_s12, %s947_s12   ;;  %s620_s11 = sphi %s651_s11, %s946_s11   ;;  %s616_s10 = sphi %s649_s10, %s945_s10   ;;  %s612_s9 = sphi %s647_s9, %s944_s9  }
   0x6   : > { %s672_s15 = sadd.s32 1, %s624_s12   ;;  %s25_s16 = sadd.s32 1, %s620_s11 }
   0x7   : > { %s22_s17 = ssub.s32 %s624_s12, %s672_s15  ;;  %p32_p0 = scmp.ne.s32.totalorder %s620_s11, %s616_s10 }
   0x8   : > { %p23_p1 = scmp.eq.s32.totalorder %s22_s17, 0  ;;  %p33_p2 = scmp.eq.s32.totalorder %s624_s12, 0 }
   0x9   : > { %p38_p3 = scmp.ne.s32.totalorder %s616_s10, %s612_s9  ;;  %p39_p4 = scmp.eq.s32.totalorder %s668_s13, 0 }
   0xa   : > { %s684_s18 = scalar_select %p23_p1, %s620_s11, %s25_s16  }
   0xb   : > { %p686_p5 = por %p33_p2, %p32_p0  ;;  %p690_p6 = por %p39_p4, %p38_p3 }
   0xc   : > { %p83_p7 = scmp.eq.s32.totalorder %s668_s13, 3  ;;  %p89_p8 = scmp.eq.s32.totalorder %s442_s14, 3 }
   0xd   : > { %p474_p9 = scmp.lt.s32.totalorder %s624_s12, 4  ;;  %s112_s23 = sand.u32 1, %s620_s11  }
   0xe   : > { %p696_p10 = por %p83_p7, %p32_p0  ;;  %p700_p11 = por %p89_p8, %p38_p3 }
   0xf   : > { %s459_s24 = sshll.u32 %s624_s12, 11  ;;  %s445_s25 = sshll.u32 %s112_s23, 7 }
  0x10   : > { %s939_s21 = scalar_select %p696_p10, 1, 0 }
  0x11   : > { %s940_s22 = scalar_select %p700_p11, 1, 0 }
  0x12   : > { %s709_s28 = scalar_lea.hbm %s933_s0, %s459_s24  ;;  %s116_s29 = scalar_lea.vmem [#allocation2], %s445_s25 }
  0x13   : > { %s124_s30 = sshll.u32 %s116_s29, 4  ;;  %p713_p12 = pnand %p474_p9, %p686_p5  ;;  %s717_s30 = int_to_ptr.vmem [resolvable:$true] %s124_s30 }
  0x14   : > { %s719_s4 = scalar_lea.sflag [#allocation3], %s112_s23  ;;  %s528_s5 = scalar_lea.hbm %s709_s28, 2048 }
  0x15   : > { %p529_p13 = scmp.ne.s32.totalorder %s709_s28, %s528_s5  ;;  %p530_p0 = pneg %p713_p12 }
  0x16   : > { %s533_s8 = scalar_lea.hbm %s933_s0, 8192  ;;  %p534_p3 = scmp.lt.u32.totalorder %s709_s28, %s933_s0 }
  0x17   : > { %p531_p1 = pnand %p530_p0, %p529_p13  ;;  %p535_p4 = scmp.lt.u32.totalorder %s533_s8, %s528_s5 }
  0x18   : > { %p537_p7 = scmp.lt.u32.totalorder %s528_s5, %s709_s28 }
  0x19   : > { %p532_p2 = pneg %p531_p1  ;;  %p536_p5 = por %p535_p4, %p534_p3 }
  0x1b   : > { %p538_p8 = por %p537_p7, %p536_p5 }
  0x1d   : > { %p539_p9 = pnand %p538_p8, %p532_p2 }
  0x1f   : > { %542 = shalt.err (!%p539_p9)
}
  0x20   : > { %s543_s17 = scalar_lea.vmem %s717_s30, 2048  ;;  %s626_s19 = smov [#allocation2]  }
  0x21   : > { %p544_p13 = scmp.ne.s32.totalorder %s717_s30, %s543_s17  ;;  %s548_s23 = sshll.u32 %s626_s19, 4  ;;  %s549_s23 = int_to_ptr.vmem [resolvable:$false] %s548_s23 }
  0x22   : > { %s550_s24 = scalar_lea.vmem %s549_s23, 4096  ;;  %p551_p10 = scmp.lt.s32.totalorder %s717_s30, %s549_s23 }
  0x23   : > { %p546_p1 = pnand %p544_p13, %p530_p0  ;;  %p552_p3 = scmp.lt.s32.totalorder %s550_s24, %s543_s17 }
  0x25   : > { %p547_p11 = pneg %p546_p1  ;;  %p553_p4 = por %p552_p3, %p551_p10 }
  0x27   : > { %p554_p5 = pnand %p553_p4, %p547_p11 }
  0x29   : > { %557 = shalt.err (!%p554_p5)
}
  0x2a   : > { %s627_s25 = smov 256   ;;  %s628_s26 = smov 16  }
  0x2b   : > { %469 = dma.hbm_to_vmem [thread:$0]  (!%p713_p12), %s709_s28, 2048, %s717_s30, %s719_s4, %s627_s25, %s627_s25, %s628_s26  }
  0x2c   : > { %p449_p0 = scmp.ge.s32.totalorder %s624_s12, 1  ;;  %p132_p2 = scmp.lt.s32.totalorder %s624_s12, 5 }
  0x2e   : > { %p133_p7 = pnand %p449_p0, %p132_p2 }
  0x2f   : > { %s750_s27 = sand.u32 (!%p133_p7), 1, %s616_s10  }
  0x30   : > { %136 = sbr.rel (%p133_p7) target bundleno = 401 (0x191), region = 28  ;;  %s450_s29 = sshll.u32 (!%p133_p7), %s750_s27, 7 }
  0x31   : > { %s139_s5 = scalar_lea.sflag (!%p133_p7), [#allocation3], %s750_s27  ;;  %s142_s6 = scalar_lea.vmem (!%p133_p7), [#allocation2], %s450_s29 }
  0x37   : > { %603 = dma.done.wait (%p690_p6), %s139_s5, 2048  }
  0x38   : > { %605 = vsyncadd (%p690_p6), %s139_s5, 4294965248  ;;  %v165_v0 = vld [vmem:[%s142_s6] sm:$0xff]  ;;  %v166_v1 = vld [vmem:[%s142_s6 + $0x8] sm:$0xff]  ;;  %s837_s30 = scalar_lea.vmem [#allocation5], %s450_s29  ;;  %s461_s3 = sshll.u32 %s668_s13, 11 }
  0x39   : > { %v169_v2 = vld [vmem:[%s142_s6 + $0x20] sm:$0xff]  ;;  %v181_v3 = vadd.f32 %v166_v1, %v165_v0  ;;  %v170_v4 = vld [vmem:[%s142_s6 + $0x28] sm:$0xff]  ;;  %v167_v5 = vld [vmem:[%s142_s6 + $0x10] sm:$0xff]  ;;  %s369_s4 = sshll.u32 %s837_s30, 4  ;;  %s884_s13 = scalar_lea.hbm %s935_s2, %s461_s3  ;;  %s886_s4 = int_to_ptr.vmem [resolvable:$true] %s369_s4 }
  0x3a   : > { %v168_v6 = vld [vmem:[%s142_s6 + $0x18] sm:$0xff]  ;;  %v187_v7 = vadd.f32 %v170_v4, %v169_v2  ;;  %v171_v8 = vld [vmem:[%s142_s6 + $0x30] sm:$0xff]  ;;  %v173_v12 = vld [vmem:[%s142_s6 + $0x40] sm:$0xff]  ;;  %s355_s14 = scalar_lea.sflag [#allocation4], %s750_s27  ;;  %s558_s16 = scalar_lea.vmem %s886_s4, 2048 }
  0x3b   : > { %v172_v9 = vld [vmem:[%s142_s6 + $0x38] sm:$0xff]  ;;  %182 = vadd.xlane.f32.xlu0 %v181_v3  ;;  %v184_v10 = vadd.f32 %v168_v6, %v167_v5  ;;  %v174_v13 = vld [vmem:[%s142_s6 + $0x48] sm:$0xff]  ;;  %v175_v14 = vld [vmem:[%s142_s6 + $0x50] sm:$0xff]  ;;  %p559_p6 = scmp.ne.s32.totalorder %s886_s4, %s558_s16  ;;  %p942_p10 = scmp.ne.s32.totalorder %s939_s21, 0 }
  0x3c   : > { %188 = vadd.xlane.f32.xlu1 %v187_v7  ;;  %v190_v11 = vadd.f32 %v172_v9, %v171_v8  ;;  %v176_v15 = vld [vmem:[%s142_s6 + $0x58] sm:$0xff]  ;;  %v193_v16 = vadd.f32 %v174_v13, %v173_v12  ;;  %v177_v18 = vld [vmem:[%s142_s6 + $0x60] sm:$0xff]  ;;  %v178_v19 = vld [vmem:[%s142_s6 + $0x68] sm:$0xff]  ;;  %s629_s17 = smov [#allocation5]  }
  0x3d   : > { %v196_v17 = vadd.f32 %v176_v15, %v175_v14  ;;  %v179_v20 = vld [vmem:[%s142_s6 + $0x70] sm:$0xff]  ;;  %v180_v21 = vld [vmem:[%s142_s6 + $0x78] sm:$0xff]  ;;  %v199_v22 = vadd.f32 %v178_v19, %v177_v18  ;;  %p560_p11 = pnand %p559_p6, %p942_p10  ;;  %s562_s19 = sshll.u32 %s629_s17, 4  ;;  %s563_s19 = int_to_ptr.vmem [resolvable:$false] %s562_s19 }
  0x3e   : > { %v202_v23 = vadd.f32 %v180_v21, %v179_v20  ;;  %s564_s23 = scalar_lea.vmem %s563_s19, 4096  ;;  %p565_p8 = scmp.lt.s32.totalorder %s886_s4, %s563_s19 }
  0x3f   : > { %185 = vadd.xlane.f32.xlu0 %v184_v10  ;;  %p561_p12 = pneg %p560_p11  ;;  %p566_p9 = scmp.lt.s32.totalorder %s564_s23, %s558_s16 }
  0x40   : > { %191 = vadd.xlane.f32.xlu1 %v190_v11 }
  0x41   : > { %p567_p13 = por %p566_p9, %p565_p8 }
  0x43   : > { %194 = vadd.xlane.f32.xlu0 %v193_v16  ;;  %p568_p1 = pnand %p567_p13, %p561_p12 }
  0x44   : > { %197 = vadd.xlane.f32.xlu1 %v196_v17 }
  0x47   : > { %200 = vadd.xlane.f32.xlu0 %v199_v22 }
  0x48   : > { %203 = vadd.xlane.f32.xlu1 %v202_v23 }
  0xc8   : > { %v183_v24 = vpop.xlane.xlu0 %182 }
  0xc9   : > { %v206_v25 = vmul.f32 0.00390625, %v183_v24  ;;  %v189_v26 = vpop.xlane.xlu1 %188 }
  0xca   : > { %v208_v27 = vmul.f32 0.00390625, %v189_v26 }
  0xcb   : > { %v760_v28 = vsub.f32 %v165_v0, %v206_v25  ;;  %v762_v29 = vsub.f32 %v166_v1, %v206_v25 }
  0xcc   : > { %v764_v30 = vsub.f32 %v169_v2, %v208_v27  ;;  %v766_v31 = vsub.f32 %v170_v4, %v208_v27  ;;  %v186_v32 = vpop.xlane.xlu0 %185 }
  0xcd   : > { %v207_v33 = vmul.f32 0.00390625, %v186_v32  ;;  %v192_v34 = vpop.xlane.xlu1 %191  ;;  %v230_v35 = vmul.f32 %v760_v28, %v760_v28  ;;  %v231_v36 = vmul.f32 %v762_v29, %v762_v29 }
  0xce   : > { %v209_v37 = vmul.f32 0.00390625, %v192_v34  ;;  %v234_v38 = vmul.f32 %v764_v30, %v764_v30  ;;  %v235_v39 = vmul.f32 %v766_v31, %v766_v31 }
  0xcf   : > { %v776_v40 = vsub.f32 %v167_v5, %v207_v33  ;;  %v778_v41 = vsub.f32 %v168_v6, %v207_v33  ;;  %v246_v42 = vadd.f32 %v231_v36, %v230_v35 }
  0xd0   : > { %v780_v43 = vsub.f32 %v171_v8, %v209_v37  ;;  %v782_v44 = vsub.f32 %v172_v9, %v209_v37  ;;  %v195_v45 = vpop.xlane.xlu0 %194  ;;  %v252_v48 = vadd.f32 %v235_v39, %v234_v38  ;;  %v294_v37 = vld [vmem:[%s934_s1] sm:$0x3] }
  0xd1   : > { %v210_v46 = vmul.f32 0.00390625, %v195_v45  ;;  %247 = vadd.xlane.f32.xlu0 %v246_v42  ;;  %v198_v47 = vpop.xlane.xlu1 %197  ;;  %v232_v49 = vmul.f32 %v776_v40, %v776_v40  ;;  %v233_v50 = vmul.f32 %v778_v41, %v778_v41 }
  0xd2   : > { %v211_v51 = vmul.f32 0.00390625, %v198_v47  ;;  %v236_v52 = vmul.f32 %v780_v43, %v780_v43  ;;  %v237_v53 = vmul.f32 %v782_v44, %v782_v44 }
  0xd3   : > { %v792_v54 = vsub.f32 %v173_v12, %v210_v46  ;;  %v794_v55 = vsub.f32 %v174_v13, %v210_v46  ;;  %v249_v56 = vadd.f32 %v233_v50, %v232_v49 }
  0xd4   : > { %v796_v57 = vsub.f32 %v175_v14, %v211_v51  ;;  %v798_v58 = vsub.f32 %v176_v15, %v211_v51  ;;  %v201_v59 = vpop.xlane.xlu0 %200  ;;  %v255_v62 = vadd.f32 %v237_v53, %v236_v52 }
  0xd5   : > { %v212_v60 = vmul.f32 0.00390625, %v201_v59  ;;  %253 = vadd.xlane.f32.xlu0 %v252_v48  ;;  %250 = vadd.xlane.f32.xlu1 %v249_v56  ;;  %v204_v61 = vpop.xlane.xlu1 %203  ;;  %v238_v63 = vmul.f32 %v792_v54, %v792_v54  ;;  %v239_v0 = vmul.f32 %v794_v55, %v794_v55 }
  0xd6   : > { %v213_v1 = vmul.f32 0.00390625, %v204_v61  ;;  %v240_v2 = vmul.f32 %v796_v57, %v796_v57  ;;  %v241_v3 = vmul.f32 %v798_v58, %v798_v58 }
  0xd7   : > { %v808_v4 = vsub.f32 %v177_v18, %v212_v60  ;;  %v810_v5 = vsub.f32 %v178_v19, %v212_v60  ;;  %v258_v6 = vadd.f32 %v239_v0, %v238_v63  ;;  %v312_v18 = vlaneseq }
  0xd8   : > { %v812_v7 = vsub.f32 %v179_v20, %v213_v1  ;;  %v814_v8 = vsub.f32 %v180_v21, %v213_v1  ;;  %v261_v9 = vadd.f32 %v241_v3, %v240_v2 }
  0xd9   : > { %256 = vadd.xlane.f32.xlu1 %v255_v62  ;;  %259 = vadd.xlane.f32.xlu0 %v258_v6  ;;  %v242_v10 = vmul.f32 %v808_v4, %v808_v4  ;;  %v243_v11 = vmul.f32 %v810_v5, %v810_v5  ;;  %v313_v24 = vshrl.u32 %v312_v18, 7 }
  0xda   : > { %v244_v12 = vmul.f32 %v812_v7, %v812_v7  ;;  %v245_v13 = vmul.f32 %v814_v8, %v814_v8 }
  0xdb   : > { %v264_v14 = vadd.f32 %v243_v11, %v242_v10  ;;  %v314_v35 = vsub.s32 0, %v313_v24  ;;  %v318_v36 = vsub.s32 1, %v313_v24 }
  0xdc   : > { %v267_v15 = vadd.f32 %v245_v13, %v244_v12 }
  0xdd   : > { %262 = vadd.xlane.f32.xlu1 %v261_v9  ;;  %265 = vadd.xlane.f32.xlu0 %v264_v14  ;;  %v827_v48 = vrot.slane %v294_v37, %v314_v35  ;;  %v829_v49 = vrot.slane %v294_v37, %v318_v36 }
  0xe1   : > { %268 = vadd.xlane.f32.xlu1 %v267_v15 }
 0x15e   : > { %v248_v16 = vpop.xlane.xlu0 %247 }
 0x15f   : > { %v270_v17 = vmul.f32 0.00390625, %v248_v16 }
 0x161   : > { %v278_v19 = vadd.f32 1e-05, %v270_v17 }
 0x162   : > { %v251_v20 = vpop.xlane.xlu1 %250  ;;  %v254_v21 = vpop.xlane.xlu0 %253 }
 0x163   : > { %512 = vrsqrt.f32 %v278_v19  ;;  %v271_v22 = vmul.f32 0.00390625, %v251_v20  ;;  %v272_v23 = vmul.f32 0.00390625, %v254_v21 }
 0x165   : > { %v279_v25 = vadd.f32 1e-05, %v271_v22  ;;  %v280_v26 = vadd.f32 1e-05, %v272_v23 }
 0x166   : > { %v257_v27 = vpop.xlane.xlu1 %256  ;;  %v260_v32 = vpop.xlane.xlu0 %259 }
 0x167   : > { %514 = vrsqrt.f32 %v279_v25  ;;  %v273_v33 = vmul.f32 0.00390625, %v257_v27  ;;  %v274_v34 = vmul.f32 0.00390625, %v260_v32 }
 0x168   : > { %516 = vrsqrt.f32 %v280_v26 }
 0x169   : > { %v281_v38 = vadd.f32 1e-05, %v273_v33  ;;  %v282_v39 = vadd.f32 1e-05, %v274_v34 }
 0x16a   : > { %v263_v42 = vpop.xlane.xlu1 %262  ;;  %v266_v45 = vpop.xlane.xlu0 %265 }
 0x16b   : > { %518 = vrsqrt.f32 %v281_v38  ;;  %v275_v46 = vmul.f32 0.00390625, %v263_v42  ;;  %v276_v47 = vmul.f32 0.00390625, %v266_v45 }
 0x16c   : > { %520 = vrsqrt.f32 %v282_v39 }
 0x16d   : > { %v513_v50 = vpop.eup %512  ;;  %v283_v51 = vadd.f32 1e-05, %v275_v46  ;;  %v284_v52 = vadd.f32 1e-05, %v276_v47 }
 0x16e   : > { %v295_v53 = vmul.f32 %v513_v50, %v760_v28  ;;  %v296_v56 = vmul.f32 %v513_v50, %v762_v29  ;;  %v269_v59 = vpop.xlane.xlu1 %268 }
 0x16f   : > { %522 = vrsqrt.f32 %v283_v51  ;;  %v277_v60 = vmul.f32 0.00390625, %v269_v59 }
 0x170   : > { %v322_v61 = vmul.f32 %v827_v48, %v295_v53  ;;  %v323_v62 = vmul.f32 %v829_v49, %v296_v56  ;;  %524 = vrsqrt.f32 %v284_v52 }
 0x171   : > { %v515_v63 = vpop.eup %514  ;;  %v285_v0 = vadd.f32 1e-05, %v277_v60 }
 0x172   : > { %v517_v1 = vpop.eup %516  ;;  %338 = vst [vmem:[%s837_s30] sm:$0xff] %v322_v61  ;;  %339 = vst [vmem:[%s837_s30 + $0x8] sm:$0xff] %v323_v62  ;;  %v297_v28 = vmul.f32 %v515_v63, %v776_v40  ;;  %v298_v29 = vmul.f32 %v515_v63, %v778_v41 }
 0x173   : > { %v299_v2 = vmul.f32 %v517_v1, %v764_v30  ;;  %v300_v3 = vmul.f32 %v517_v1, %v766_v31  ;;  %526 = vrsqrt.f32 %v285_v0 }
 0x174   : > { %v324_v6 = vmul.f32 %v827_v48, %v297_v28  ;;  %v325_v9 = vmul.f32 %v829_v49, %v298_v29 }
 0x175   : > { %v519_v10 = vpop.eup %518  ;;  %v326_v11 = vmul.f32 %v827_v48, %v299_v2  ;;  %v327_v12 = vmul.f32 %v829_v49, %v300_v3 }
 0x176   : > { %v521_v13 = vpop.eup %520  ;;  %340 = vst [vmem:[%s837_s30 + $0x10] sm:$0xff] %v324_v6  ;;  %341 = vst [vmem:[%s837_s30 + $0x18] sm:$0xff] %v325_v9  ;;  %v301_v40 = vmul.f32 %v519_v10, %v780_v43  ;;  %v302_v30 = vmul.f32 %v519_v10, %v782_v44 }
 0x177   : > { %342 = vst [vmem:[%s837_s30 + $0x20] sm:$0xff] %v326_v11  ;;  %343 = vst [vmem:[%s837_s30 + $0x28] sm:$0xff] %v327_v12  ;;  %v303_v31 = vmul.f32 %v521_v13, %v792_v54  ;;  %v304_v41 = vmul.f32 %v521_v13, %v794_v55 }
 0x178   : > { %v328_v14 = vmul.f32 %v827_v48, %v301_v40  ;;  %v329_v15 = vmul.f32 %v829_v49, %v302_v30 }
 0x179   : > { %v523_v16 = vpop.eup %522  ;;  %v330_v17 = vmul.f32 %v827_v48, %v303_v31  ;;  %v331_v43 = vmul.f32 %v829_v49, %v304_v41 }
 0x17a   : > { %v525_v18 = vpop.eup %524  ;;  %344 = vst [vmem:[%s837_s30 + $0x30] sm:$0xff] %v328_v14  ;;  %345 = vst [vmem:[%s837_s30 + $0x38] sm:$0xff] %v329_v15  ;;  %v305_v44 = vmul.f32 %v523_v16, %v796_v57  ;;  %v306_v54 = vmul.f32 %v523_v16, %v798_v58 }
 0x17b   : > { %346 = vst [vmem:[%s837_s30 + $0x40] sm:$0xff] %v330_v17  ;;  %347 = vst [vmem:[%s837_s30 + $0x48] sm:$0xff] %v331_v43  ;;  %v307_v55 = vmul.f32 %v525_v18, %v808_v4  ;;  %v308_v19 = vmul.f32 %v525_v18, %v810_v5 }
 0x17c   : > { %v332_v20 = vmul.f32 %v827_v48, %v305_v44  ;;  %v333_v21 = vmul.f32 %v829_v49, %v306_v54 }
 0x17d   : > { %v527_v57 = vpop.eup %526  ;;  %v334_v58 = vmul.f32 %v827_v48, %v307_v55  ;;  %v335_v22 = vmul.f32 %v829_v49, %v308_v19 }
 0x17e   : > { %348 = vst [vmem:[%s837_s30 + $0x50] sm:$0xff] %v332_v20  ;;  %349 = vst [vmem:[%s837_s30 + $0x58] sm:$0xff] %v333_v21  ;;  %v309_v4 = vmul.f32 %v527_v57, %v812_v7  ;;  %v310_v5 = vmul.f32 %v527_v57, %v814_v8 }
 0x17f   : > { %350 = vst [vmem:[%s837_s30 + $0x60] sm:$0xff] %v334_v58  ;;  %351 = vst [vmem:[%s837_s30 + $0x68] sm:$0xff] %v335_v22 }
 0x180   : > { %v336_v23 = vmul.f32 %v827_v48, %v309_v4  ;;  %v337_v24 = vmul.f32 %v829_v49, %v310_v5 }
 0x182   : > { %352 = vst [vmem:[%s837_s30 + $0x70] sm:$0xff] %v336_v23  ;;  %353 = vst [vmem:[%s837_s30 + $0x78] sm:$0xff] %v337_v24 }
 0x183   : > { %571 = shalt.err (!%p568_p1)
}
 0x184   : > { %s572_s24 = scalar_lea.hbm %s884_s13, 2048  ;;  %s576_s29 = scalar_lea.hbm %s935_s2, 8192 }
 0x185   : > { %p573_p3 = scmp.ne.s32.totalorder %s884_s13, %s572_s24  ;;  %p577_p0 = scmp.lt.u32.totalorder %s884_s13, %s935_s2 }
 0x186   : > { %p578_p2 = scmp.lt.u32.totalorder %s576_s29, %s572_s24  ;;  %p580_p6 = scmp.lt.u32.totalorder %s572_s24, %s884_s13 }
 0x187   : > { %p574_p4 = pnand %p573_p3, %p942_p10 }
 0x188   : > { %p579_p7 = por %p578_p2, %p577_p0 }
 0x189   : > { %p575_p5 = pneg %p574_p4 }
 0x18a   : > { %p581_p11 = por %p580_p6, %p579_p7 }
 0x18c   : > { %p582_p12 = pnand %p581_p11, %p575_p5 }
 0x18e   : > { %585 = shalt.err (!%p582_p12)
}
 0x18f   : > { %s630_s20 = smov 256   ;;  %s631_s28 = smov 16  }
 0x190   : > { %464 = dma.vmem_to_hbm [thread:$0]  (%p942_p10), %s886_s4, 2048, %s884_s13, %s355_s14, %s630_s20, %s630_s20, %s631_s28  }
 0x191 PF: > { %p475_p8 = scmp.ge.s32.totalorder %s624_s12, 2  ;;  %s384_s30 = sand.u32 1, %s612_s9  }
 0x192   : > { %p943_p9 = scmp.ne.s32.totalorder %s940_s22, 0  ;;  %s385_s3 = scalar_lea.sflag [#allocation4], %s384_s30 }
 0x194   : > { %p471_p13 = pnand %p475_p8, %p943_p9 }
 0x196   : > { %607 = dma.done.wait (!%p471_p13), %s385_s3, 2048  }
 0x197   : > { %609 = vsyncadd (!%p471_p13), %s385_s3, 4294965248  ;;  %p15_p1 = scmp.ge.s32.totalorder %s672_s15, 6   ;;  %s944_s9 = smov %s616_s10 }
 0x198   : > { %s945_s10 = smov %s620_s11  ;;  %s946_s11 = smov %s684_s18 }
 0x199   : > { %s947_s12 = smov %s672_s15  ;;  %17 = sbr.rel (!%p15_p1) target bundleno = 5 (0x5), region = 73 }
 0x1a0   :  { %390 = vsyncpa [#allocation3], 1 }
 0x1a1   :  { %392 = vsyncpa [#allocation3 + $0x1], 1 }
 0x1a2   :  { %393 = vsyncpa [#allocation4], 1 }
 0x1a3   :  { %395 = vsyncpa [#allocation4 + $0x1], 1 }

</bundles_post_ra>
